<compile_context>
chip_gen: v6e
topology: v6e:2x2x1
jax: 0.10.0
libtpu: 0.0.40
codegen_flags: <defaults>
</compile_context>

<pallas_src>
import functools
import math

import jax
import jax.numpy as jnp
from jax.experimental import pallas as pl
from jax.experimental.pallas import tpu as pltpu

_LANES = 128
_SUBLANES = 8
# ~4 MiB per block: 2 double-buffered in + out blocks ~= 16 MiB VMEM, inside the
# default scoped limit on v6e/v7x and well under every chip's physical VMEM.
# (On v7x, ~8 MiB blocks would shave a few more % of grid-step overhead.)
_BLOCK_BYTES = 4 * 1024 * 1024


def _drop_path_kernel(scale_ref, x_ref, o_ref):
    # scale_ref: (TB, 1, 1) f32 in VMEM; x_ref / o_ref: (TB, block_rows, 128).
    # Pure streaming multiply; per-sample broadcast is free on the VPU.
    # (Kernel is DMA-bound, so the f32 promotion for sub-32-bit dtypes is free.)
    o_ref[...] = (x_ref[...] * scale_ref[...]).astype(o_ref.dtype)


def _choose_blocks(batch, rows, itemsize):
    """Pick (tb, block_rows) for a lane-dense (B, rows, 128) slab."""
    row_bytes = _LANES * itemsize
    max_rows = max(_SUBLANES, (_BLOCK_BYTES // row_bytes) // _SUBLANES * _SUBLANES)
    if rows >= max_rows:
        # Large-feature path: one sample per block, tile the row axis.  The
        # ragged last row-block (if any) is masked by Pallas -- no over-padding.
        return 1, max_rows
    # Small-feature / large-batch path: the whole row extent per block (legal
    # because it equals the full array dim), and several samples per step so
    # the ~0.35us per-grid-step overhead is amortized.
    tb = max(1, _BLOCK_BYTES // (rows * row_bytes))
    return min(batch, tb), rows


@functools.partial(jax.jit, static_argnames=("drop_prob", "training"))
def drop_path(x, *, drop_prob, key, training=True):
    """DropPath forward.  x: (B, ...) -- the mask depends only on the batch axis."""
    if drop_prob == 0.0 or not training:
        return x
    keep_prob = 1.0 - float(drop_prob)
    B = x.shape[0]
    feat = math.prod(x.shape[1:])

    # Per-sample Bernoulli(keep_prob) via the same floor trick as PyTorch,
    # pre-divided by keep_prob so the kernel is a single multiply.
    u = jax.random.uniform(key, (B,), dtype=jnp.float32)
    scale = (jnp.floor(keep_prob + u) * (1.0 / keep_prob)).reshape(B, 1, 1)

    itemsize = jnp.dtype(x.dtype).itemsize
    rows = pl.cdiv(feat, _LANES)
    padded_feat = rows * _LANES

    x_flat = x.reshape(B, feat)
    if padded_feat != feat:
        # Fallback only when the flattened feature dim is not lane-aligned.
        x_flat = jnp.pad(x_flat, ((0, 0), (0, padded_feat - feat)))
    x3 = x_flat.reshape(B, rows, _LANES)

    tb, block_rows = _choose_blocks(B, rows, itemsize)
    grid = (pl.cdiv(B, tb), pl.cdiv(rows, block_rows))

    out3 = pl.pallas_call(
        _drop_path_kernel,
        out_shape=jax.ShapeDtypeStruct((B, rows, _LANES), x.dtype),
        grid=grid,
        in_specs=[
            pl.BlockSpec((tb, 1, 1), lambda b, r: (b, 0, 0)),
            pl.BlockSpec((tb, block_rows, _LANES), lambda b, r: (b, r, 0)),
        ],
        out_specs=pl.BlockSpec((tb, block_rows, _LANES), lambda b, r: (b, r, 0)),
        compiler_params=pltpu.CompilerParams(
            dimension_semantics=("parallel", "parallel"),
            vmem_limit_bytes=40 * 1024 * 1024,
        ),
        cost_estimate=pl.CostEstimate(
            flops=B * padded_feat,
            transcendentals=0,
            bytes_accessed=2 * B * padded_feat * itemsize,
        ),
    )(scale, x3)

    out_flat = out3.reshape(B, padded_feat)
    if padded_feat != feat:
        out_flat = out_flat[:, :feat]
    return out_flat.reshape(x.shape)


if __name__ == "__main__":
    key = jax.random.PRNGKey(0)
    x_key, mask_key, x2_key = jax.random.split(key, 3)

    drop_prob = 0.25
    keep_prob = 1.0 - drop_prob

    # Lane-aligned case (feat % 128 == 0): no pad/slice in the wrapper.
    B, L, D = 2, 8, 32
    x = jax.random.normal(x_key, (B, L, D), dtype=jnp.float32)
    out = jax.block_until_ready(
        drop_path(x, drop_prob=drop_prob, key=mask_key, training=True))

    # Reference: recompute the per-sample scale exactly as the wrapper does.
    u = jax.random.uniform(mask_key, (B,), dtype=jnp.float32)
    ref_scale = jnp.floor(keep_prob + u) * (1.0 / keep_prob)
    ref = x * ref_scale[:, None, None]
    assert jnp.allclose(out, ref, rtol=1e-6, atol=1e-6), "mismatch vs reference"

    # Each sample is either exactly zero or x / keep_prob (valid DropPath output).
    for b in range(B):
        ob = out[b]
        is_zero = bool(jnp.all(ob == 0.0))
        is_scaled = bool(jnp.allclose(ob, x[b] / keep_prob, rtol=1e-6, atol=1e-6))
        assert is_zero or is_scaled, f"sample {b}: not a valid DropPath output"

    # Non-lane-aligned case exercises the pad/slice fallback path.
    x2 = jax.random.normal(x2_key, (4, 5, 7), dtype=jnp.float32)
    out2 = jax.block_until_ready(
        drop_path(x2, drop_prob=drop_prob, key=mask_key, training=True))
    u2 = jax.random.uniform(mask_key, (4,), dtype=jnp.float32)
    ref2 = x2 * (jnp.floor(keep_prob + u2) * (1.0 / keep_prob))[:, None, None]
    assert jnp.allclose(out2, ref2, rtol=1e-6, atol=1e-6), "mismatch (unaligned feat)"

    # Eval mode / drop_prob == 0 -> identity.
    out_eval = jax.block_until_ready(
        drop_path(x, drop_prob=drop_prob, key=mask_key, training=False))
    assert bool(jnp.array_equal(out_eval, x))
    out_p0 = jax.block_until_ready(
        drop_path(x, drop_prob=0.0, key=mask_key, training=True))
    assert bool(jnp.array_equal(out_p0, x))

    print("KERNEL_OK")
</pallas_src>

<mosaic_0001>
module attributes {stable_mosaic.version = 11 : i64} {
  func.func @_drop_path_kernel(%arg0: i32, %arg1: i32, %arg2: memref<2x1x1xf32, #tpu.memory_space<vmem>>, %arg3: memref<2x2x128xf32, #tpu.memory_space<vmem>>, %arg4: memref<2x2x128xf32, #tpu.memory_space<vmem>>) attributes {dimension_semantics = [#tpu.dimension_semantics<parallel>, #tpu.dimension_semantics<parallel>], iteration_bounds = array<i64: 1, 1>, scalar_prefetch = 0 : i64, scratch_operands = 0 : i64, tpu.core_type = #tpu.core_type<tc>, window_params = [{transform_indices = @transform_0, window_bounds = array<i64: 2, 1, 1>}, {transform_indices = @transform_1, window_bounds = array<i64: 2, 2, 128>}, {transform_indices = @transform_2, window_bounds = array<i64: 2, 2, 128>}]} {
    %c0 = arith.constant 0 : index
    %c0_0 = arith.constant 0 : index
    %c0_1 = arith.constant 0 : index
    %0 = vector.load %arg3[%c0, %c0_0, %c0_1] : memref<2x2x128xf32, #tpu.memory_space<vmem>>, vector<2x2x128xf32>
    %c0_2 = arith.constant 0 : index
    %c0_3 = arith.constant 0 : index
    %c0_4 = arith.constant 0 : index
    %1 = vector.load %arg2[%c0_2, %c0_3, %c0_4] : memref<2x1x1xf32, #tpu.memory_space<vmem>>, vector<2x1x1xf32>
    %2 = vector.broadcast %1 : vector<2x1x1xf32> to vector<2x2x128xf32>
    %3 = arith.mulf %0, %2 : vector<2x2x128xf32>
    %c0_5 = arith.constant 0 : index
    %c0_6 = arith.constant 0 : index
    %c0_7 = arith.constant 0 : index
    %4 = vector.load %arg4[%c0_5, %c0_6, %c0_7] : memref<2x2x128xf32, #tpu.memory_space<vmem>>, vector<2x2x128xf32>
    tpu.vector_store %arg4[%c0_5, %c0_6, %c0_7], %3 {strides = array<i32>} : memref<2x2x128xf32, #tpu.memory_space<vmem>>, vector<2x2x128xf32>,
    return
  }
  func.func @transform_0(%arg0: i32, %arg1: i32) -> (i32, i32, i32) {
    %c0_i32 = arith.constant 0 : i32
    %c0_i32_0 = arith.constant 0 : i32
    %c0_i32_1 = arith.constant 0 : i32
    return %arg0, %c0_i32, %c0_i32_0 : i32, i32, i32
  }
  func.func @transform_1(%arg0: i32, %arg1: i32) -> (i32, i32, i32) {
    %c0_i32 = arith.constant 0 : i32
    %c0_i32_0 = arith.constant 0 : i32
    return %arg0, %arg1, %c0_i32 : i32, i32, i32
  }
  func.func @transform_2(%arg0: i32, %arg1: i32) -> (i32, i32, i32) {
    %c0_i32 = arith.constant 0 : i32
    %c0_i32_0 = arith.constant 0 : i32
    return %arg0, %arg1, %c0_i32 : i32, i32, i32
  }
}

</mosaic_0001>

<bundles_post_ra>
// kernel: drop_path.1
= control target key start
LH: loop header
LB: loop body
LE: loop exit
PB: predicated region body
PF: predicated region fallthrough
CT: control target
= control target key end

     0   :  { %v45_v0 = vmov 0   ;;  %s79_s0 = inlined_call_operand.vmem [shape: f32[2,1,1], index: 0, kind: input, shape index: {}]   ;;  %s80_s1 = inlined_call_operand.vmem [shape: f32[2,2,128], index: 1, kind: input, shape index: {}]   ;;  %s81_s2 = inlined_call_operand.vmem [shape: f32[2,2,128], index: 2, kind: output, shape index: {}]  }
   0x1   :  { %44 = vset.pattern.permute.xlu0 %v45_v0  ;;  %v41_v1 = vld [vmem:[%s79_s0] ss:$0 sm:$0xff]  ;;  %v42_v2 = vld [vmem:[%s79_s0 + $0x1] ss:$0 sm:$0xff]  ;;  %v12_v6 = vld [vmem:[%s80_s1 + $0x2] sm:$0x3] }
   0x2   :  { %26 = vperm.xlu0 %44, %v41_v1   ;;  %v11_v3 = vld [vmem:[%s80_s1] sm:$0x3] }
   0x6   :  { %30 = vperm.xlu0 %44, %v42_v2  }
  0x7d   :  { %v27_v4 = vpop.permute.xlu0 %26 }
  0x7e   :  { %v33_v5 = vmul.f32 %v27_v4, %v11_v3 }
  0x80   :  { %35 = vst [vmem:[%s81_s2] sm:$0x3] %v33_v5 }
  0x81   :  { %v31_v7 = vpop.permute.xlu0 %30 }
  0x82   :  { %v34_v8 = vmul.f32 %v31_v7, %v12_v6 }
  0x84   :  { %36 = vst [vmem:[%s81_s2 + $0x2] sm:$0x3] %v34_v8 }

</bundles_post_ra>
